<compile_context>
chip_gen: v7x
topology: tpu7x:2x2x1
jax: 0.10.0
libtpu: 0.0.40
codegen_flags: <defaults>
</compile_context>

<pallas_src>
import functools
import math

import jax
import jax.numpy as jnp
import numpy as np
from jax.experimental import pallas as pl
from jax.experimental.pallas import tpu as pltpu

_LANE = 128
_SUBLANE = 8
_MiB = 1024 * 1024


def _round_up(x: int, m: int) -> int:
    return (x + m - 1) // m * m


# --------------------------------------------------------------------------
# Kernels
# --------------------------------------------------------------------------
def _onehot_kernel(idx_ref, w_ref, out_ref, *, scale):
    # idx_ref: (T, 1) int32 ids (sublane-major: exactly what the one-hot broadcast wants).
    # w_ref:   (V_pad, E_tile) embedding slab, VMEM-resident across the token-block axis.
    # out_ref: (T, E_tile) scaled rows (lane-dense -> unmasked stores).
    ids = idx_ref[...]                                       # (T, 1)
    t = ids.shape[0]
    vocab = w_ref.shape[0]
    tok = jax.lax.broadcasted_iota(jnp.int32, (t, vocab), 1)
    onehot = (ids == tok).astype(w_ref.dtype)                # exact 0/1 -> exact gather
    rows = jnp.dot(onehot, w_ref[...],
                   preferred_element_type=jnp.float32)       # (T, E_tile) via MXU
    # The *sqrt(d_model) scale rides in a free VALU slot of a writeback-bound kernel.
    out_ref[...] = (rows * scale).astype(out_ref.dtype)


def _gather_kernel(idx_ref, w_ref, out_ref, *, scale):
    # Large-vocab path: row gather on the VMEM-resident slab instead of a
    # one-hot MXU matmul (avoids 2*T*V*E MACs dwarfing the ~T*E writeback).
    ids = idx_ref[...][:, 0]                                 # (T,)
    rows = jnp.take(w_ref[...], ids, axis=0).astype(jnp.float32)
    out_ref[...] = (rows * scale).astype(out_ref.dtype)


# --------------------------------------------------------------------------
# Init-time helpers (hoisted out of the per-call path)
# --------------------------------------------------------------------------
def pad_embedding_table(weight, table_dtype=None):
    """Pad (n_tokens, emb) -> (round_up(V,128), round_up(E,128)). Do ONCE at init;
    doing it per forward costs an extra full-table HBM read + write.
    table_dtype=jnp.bfloat16 halves VMEM footprint / boosts MXU throughput
    (outputs then carry bf16-rounded values - caller must accept that)."""
    n_tokens, emb = weight.shape
    dtype = weight.dtype if table_dtype is None else table_dtype
    vocab_pad = _round_up(n_tokens, _LANE)
    emb_pad = _round_up(emb, _LANE)
    w_pad = jnp.zeros((vocab_pad, emb_pad), dtype)
    return w_pad.at[:n_tokens, :emb].set(weight.astype(dtype))


def _vmem_capacity_bytes(default=64 * _MiB):
    try:
        cap = getattr(pltpu.get_tpu_info(), "vmem_capacity_bytes", None)
        if cap:
            return int(cap)
    except Exception:
        pass
    return default  # unknown chip: assume the smallest (v7x-sized) VMEM


def _buffered_one():
    """pl.Buffered(1) if this jax supports BlockSpec(pipeline_mode=...), else None."""
    buffered = getattr(pl, "Buffered", None)
    if buffered is None:
        return None
    try:
        pl.BlockSpec((_SUBLANE, _LANE), lambda i: (0, 0), pipeline_mode=buffered(1))
    except TypeError:
        return None
    return buffered(1)


def _choose_token_block(n: int, tokens_per_block: int) -> int:
    n8 = _round_up(max(n, 1), _SUBLANE)
    cap = _round_up(min(int(tokens_per_block), n8), _SUBLANE)
    # v7x megacore: keep >= 2 token blocks when there is enough work so the
    # "parallel" axis has something to shard across the two TensorCores.
    if n8 >= 2 * _SUBLANE:
        cap = min(cap, _round_up(-(-n8 // 2), _SUBLANE))
    # Prefer a block that tiles n exactly (n_pad == n -> no padded writeback).
    for t in range(cap, _SUBLANE - 1, -_SUBLANE):
        if n % t == 0:
            return t
    return cap


def _vmem_needed(t_blk, vocab_pad, e_tile, table_itemsize, out_itemsize,
                 table_buffers, use_onehot):
    table = table_buffers * vocab_pad * e_tile * table_itemsize
    out = 2 * t_blk * e_tile * out_itemsize      # double-buffered output blocks
    idx = 2 * t_blk * _LANE * 4                  # (T,1) i32 lane-pads to (T,128) per buffer
    tmp = t_blk * e_tile * 4                     # f32 MXU / gather result
    if use_onehot:
        tmp += t_blk * vocab_pad * table_itemsize  # one-hot intermediate
    return table + out + idx + tmp + 2 * _MiB    # + headroom for Mosaic scratch


# --------------------------------------------------------------------------
# Forward
# --------------------------------------------------------------------------
def index_text_encoder_fwd(src, w_pad, *, n_tokens, emb, d_model,
                           tokens_per_block=1024,
                           onehot_vocab_limit=2048,
                           single_buffer_table=None):
    """src: [seq_len, batch] int ids; w_pad: padded table from pad_embedding_table."""
    seq_len, batch = src.shape
    vocab_pad, emb_pad = w_pad.shape
    n = seq_len * batch
    scale = float(math.sqrt(float(d_model)))

    # Out-of-range ids are clamped (silent; matches nn.Embedding's "undefined
    # behaviour" contract rather than failing).
    idx = jnp.clip(src.reshape(n).astype(jnp.int32), 0, n_tokens - 1)

    t_blk = _choose_token_block(n, tokens_per_block)
    n_pad = _round_up(n, t_blk)
    if n_pad != n:
        idx = jnp.pad(idx, (0, n_pad - n))
    idx = idx.reshape(n_pad, 1)

    use_onehot = n_tokens <= onehot_vocab_limit
    kernel = functools.partial(_onehot_kernel if use_onehot else _gather_kernel,
                               scale=scale)

    out_dtype = w_pad.dtype
    table_itemsize = jnp.dtype(w_pad.dtype).itemsize
    out_itemsize = jnp.dtype(out_dtype).itemsize

    # ---- VMEM budget / capacity -----------------------------------------
    capacity = _vmem_capacity_bytes()
    budget_cap = int(0.85 * capacity)            # leave headroom for Mosaic scratch

    full_table_bytes = vocab_pad * emb_pad * table_itemsize
    if single_buffer_table is None:
        single_buffer_table = full_table_bytes >= 4 * _MiB  # only bother when it matters
    buffered_one = _buffered_one() if single_buffer_table else None
    table_buffers = 1 if buffered_one is not None else 2

    def fits(e):
        return _vmem_needed(t_blk, vocab_pad, e, table_itemsize, out_itemsize,
                            table_buffers, use_onehot) <= budget_cap

    # Column tile: largest multiple of 128 dividing emb_pad that fits the budget.
    e_tile = emb_pad
    while e_tile > _LANE and (emb_pad % e_tile != 0 or not fits(e_tile)):
        e_tile -= _LANE
    # TODO(synk): if even (vocab_pad, 128) does not fit, fall back to an
    # HBM-resident table with per-row make_async_copy gather (not implemented).

    needed = _vmem_needed(t_blk, vocab_pad, e_tile, table_itemsize, out_itemsize,
                          table_buffers, use_onehot)
    vmem_limit = int(min(max(needed, 32 * _MiB), budget_cap))

    num_tok_blocks = n_pad // t_blk
    num_col_tiles = emb_pad // e_tile

    def table_spec(index_map):
        # Constant block index along the token axis -> single buffer when supported.
        if buffered_one is not None:
            return pl.BlockSpec((vocab_pad, e_tile), index_map,
                                pipeline_mode=buffered_one)
        return pl.BlockSpec((vocab_pad, e_tile), index_map)

    if num_col_tiles == 1:
        grid = (num_tok_blocks,)
        in_specs = [pl.BlockSpec((t_blk, 1), lambda i: (i, 0)),
                    table_spec(lambda i: (0, 0))]
        out_specs = pl.BlockSpec((t_blk, e_tile), lambda i: (i, 0))
        dim_sem = ("parallel",)
    else:
        # Column axis OUTER so each table slab is read from HBM exactly once;
        # token blocks revisit the resident slab on the inner axis.
        grid = (num_col_tiles, num_tok_blocks)
        in_specs = [pl.BlockSpec((t_blk, 1), lambda j, i: (i, 0)),
                    table_spec(lambda j, i: (0, j))]
        out_specs = pl.BlockSpec((t_blk, e_tile), lambda j, i: (i, j))
        # Conservative semantics for the tiled fallback (single-pass table reads
        # matter more than megacore sharding here).
        dim_sem = ("arbitrary", "arbitrary")

    out_pad = pl.pallas_call(
        kernel,
        out_shape=jax.ShapeDtypeStruct((n_pad, emb_pad), out_dtype),
        grid_spec=pltpu.PrefetchScalarGridSpec(
            num_scalar_prefetch=0,
            grid=grid,
            in_specs=in_specs,
            out_specs=out_specs,
        ),
        compiler_params=pltpu.CompilerParams(
            dimension_semantics=dim_sem,
            vmem_limit_bytes=vmem_limit,
        ),
    )(idx, w_pad)

    out = out_pad if n_pad == n else out_pad[:n]
    # NOTE: downstream consumers that accept the (n, emb_pad) lane-padded layout
    # should take `out` directly and skip this column slice.
    return out[:, :emb].reshape(seq_len, batch, emb)


def index_text_encoder(src, weight, d_model, **kwargs):
    """Convenience wrapper (pads per call). Prefer pad_embedding_table once at
    init + index_text_encoder_fwd in the hot path."""
    n_tokens, emb = weight.shape
    w_pad = pad_embedding_table(weight)
    return index_text_encoder_fwd(src, w_pad, n_tokens=n_tokens, emb=emb,
                                  d_model=d_model, **kwargs)


# --------------------------------------------------------------------------
# Demo / correctness check
# --------------------------------------------------------------------------
if __name__ == "__main__":
    n_tokens = 50
    d_model = 32          # embedding dim = d_model - 1 = 31
    init_range = 0.1
    seq_len, batch = 8, 2

    key = jax.random.PRNGKey(0)
    k_w, k_src = jax.random.split(key)

    # Deterministic "uniform_(-init_range, init_range)" init of the embedding.
    weight = jax.random.uniform(
        k_w, (n_tokens, d_model - 1), dtype=jnp.float32,
        minval=-init_range, maxval=init_range)
    src = jax.random.randint(k_src, (seq_len, batch), 0, n_tokens, dtype=jnp.int32)

    # Pad the table ONCE (init-time), then run the jitted forward.
    w_pad = pad_embedding_table(weight)
    fwd = jax.jit(functools.partial(
        index_text_encoder_fwd,
        n_tokens=n_tokens, emb=d_model - 1, d_model=d_model))

    out = jax.block_until_ready(fwd(src, w_pad))

    # Pure-JAX reference check.
    ref = jnp.take(weight, src.reshape(-1), axis=0).reshape(
        seq_len, batch, d_model - 1) * math.sqrt(float(d_model))
    assert out.shape == (seq_len, batch, d_model - 1)
    np.testing.assert_allclose(np.asarray(out), np.asarray(ref),
                               rtol=1e-5, atol=1e-6)

    print("KERNEL_OK")
</pallas_src>

<mosaic_0001>
module attributes {stable_mosaic.version = 11 : i64} {
  func.func @_onehot_kernel(%arg0: i32, %arg1: memref<8x1xi32, #tpu.memory_space<vmem>>, %arg2: memref<128x128xf32, #tpu.memory_space<vmem>>, %arg3: memref<8x128xf32, #tpu.memory_space<vmem>>) attributes {dimension_semantics = [#tpu.dimension_semantics<parallel>], iteration_bounds = array<i64: 2>, scalar_prefetch = 0 : i64, scratch_operands = 0 : i64, tpu.core_type = #tpu.core_type<tc>, window_params = [{transform_indices = @transform_0, window_bounds = array<i64: 8, 1>}, {pipeline_mode = #tpu.pipeline_mode<synchronous>, transform_indices = @transform_1, window_bounds = array<i64: 128, 128>}, {transform_indices = @transform_2, window_bounds = array<i64: 8, 128>}]} {
    %c0 = arith.constant 0 : index
    %c0_0 = arith.constant 0 : index
    %0 = vector.load %arg1[%c0, %c0_0] : memref<8x1xi32, #tpu.memory_space<vmem>>, vector<8x1xi32>
    %1 = tpu.iota {dimensions = array<i32: 1>} : vector<8x128xi32>
    %2 = vector.broadcast %0 : vector<8x1xi32> to vector<8x128xi32>
    %3 = arith.cmpi eq, %2, %1 : vector<8x128xi32>
    %4 = arith.extui %3 : vector<8x128xi1> to vector<8x128xi32>
    %5 = arith.sitofp %4 : vector<8x128xi32> to vector<8x128xf32>
    %c0_1 = arith.constant 0 : index
    %c0_2 = arith.constant 0 : index
    %6 = vector.load %arg2[%c0_1, %c0_2] : memref<128x128xf32, #tpu.memory_space<vmem>>, vector<128x128xf32>
    %cst = arith.constant dense<0.000000e+00> : vector<8x128xf32>
    %7 = tpu.matmul %5, %6, %cst {dimension_numbers = #tpu.dot_dimension_numbers<[1], [0], [0], [1], [0, 0, 1, 1], [], []>} : vector<8x128xf32>, vector<128x128xf32>, vector<8x128xf32> -> vector<8x128xf32>
    %cst_3 = arith.constant 5.65685415 : f32
    %8 = vector.broadcast %cst_3 : f32 to vector<8x128xf32>
    %9 = arith.mulf %7, %8 : vector<8x128xf32>
    %c0_4 = arith.constant 0 : index
    %c0_5 = arith.constant 0 : index
    %10 = vector.load %arg3[%c0_4, %c0_5] : memref<8x128xf32, #tpu.memory_space<vmem>>, vector<8x128xf32>
    tpu.vector_store %arg3[%c0_4, %c0_5], %9 {strides = array<i32>} : memref<8x128xf32, #tpu.memory_space<vmem>>, vector<8x128xf32>,
    return
  }
  func.func @transform_0(%arg0: i32) -> (i32, i32) {
    %c0_i32 = arith.constant 0 : i32
    %c0_i32_0 = arith.constant 0 : i32
    return %arg0, %c0_i32 : i32, i32
  }
  func.func @transform_1(%arg0: i32) -> (i32, i32) {
    %c0_i32 = arith.constant 0 : i32
    %c0_i32_0 = arith.constant 0 : i32
    %c0_i32_1 = arith.constant 0 : i32
    return %c0_i32, %c0_i32_0 : i32, i32
  }
  func.func @transform_2(%arg0: i32) -> (i32, i32) {
    %c0_i32 = arith.constant 0 : i32
    %c0_i32_0 = arith.constant 0 : i32
    return %arg0, %c0_i32 : i32, i32
  }
}

</mosaic_0001>

<bundles_post_ra>
// kernel: index_text_encoder_fwd.1
= control target key start
LH: loop header
LB: loop body
LE: loop exit
PB: predicated region body
PF: predicated region fallthrough
CT: control target
= control target key end

     0   :  { %7 = vsyncpa [#allocation3], 0  ;;  %s739_s0 = inlined_call_operand.vmem [shape: s32[16,1], index: 0, kind: input, shape index: {}]   ;;  %s740_s1 = inlined_call_operand.hbm [shape: f32[128,128], index: 1, kind: input, shape index: {}]   ;;  %s741_s2 = inlined_call_operand.hbm [shape: f32[16,128], index: 2, kind: output, shape index: {}]  }
   0x1   :  { %8 = vsyncpa [#allocation4], 0 }
   0x2   :  { %10 = vsyncpa [#allocation4 + $0x1], 0  ;;  %s604_s9 = smov 0   ;;  %s606_s10 = smov 0  }
   0x3   :  { %s608_s11 = smov 0   ;;  %s610_s12 = smov 0  }
   0x4 LB: > { %s625_s13 = sadd.s32 4294967295, %s578_s12   ;;  %s336_s14 = sadd.s32 4294967294, %s578_s12   ;;  %s578_s12 = sphi %s610_s12, %s757_s12   ;;  %s574_s11 = sphi %s608_s11, %s756_s11   ;;  %s570_s10 = sphi %s606_s10, %s755_s10   ;;  %s566_s9 = sphi %s604_s9, %s754_s9  }
   0x5   : > { %s629_s15 = sadd.s32 1, %s578_s12   ;;  %s70_s16 = sadd.s32 1, %s574_s11 }
   0x6   : > { %s67_s17 = ssub.s32 %s578_s12, %s629_s15  ;;  %p80_p0 = scmp.ne.s32.totalorder %s574_s11, %s570_s10 }
   0x7   : > { %p68_p1 = scmp.eq.s32.totalorder %s67_s17, 0  ;;  %p81_p2 = scmp.eq.s32.totalorder %s625_s13, 1 }
   0x8   : > { %p86_p3 = scmp.ne.s32.totalorder %s570_s10, %s566_s9  ;;  %p87_p4 = scmp.eq.s32.totalorder %s336_s14, 1 }
   0x9   : > { %s640_s18 = scalar_select %p68_p1, %s574_s11, %s70_s16  }
   0xa   : > { %p642_p5 = por %p81_p2, %p80_p0  ;;  %p646_p6 = por %p87_p4, %p86_p3 }
   0xb   : > { %p337_p7 = scmp.ge.s32.totalorder %s578_s12, 1  ;;  %p94_p8 = scmp.lt.s32.totalorder %s578_s12, 3 }
   0xc   : > { %s745_s19 = scalar_select %p642_p5, 1, 0 }
   0xd   : > { %s746_s20 = scalar_select %p646_p6, 1, 0 }
   0xe   : > { %p742_p9 = scmp.eq.s32.totalorder %s625_s13, 0  ;;  %p653_p10 = pnand %p337_p7, %p94_p8 }
   0xf   : > { %s580_s22 = smov [#allocation2]   ;;  %s484_s27 = scalar_lea.hbm %s740_s1, 2048 }
  0x10   : > { %s747_s21 = scalar_select %p653_p10, 1, 0 }
  0x11   : > { %s106_s23 = sshll.u32 %s580_s22, 4  ;;  %p432_p11 = pneg %p653_p10  ;;  %s107_s23 = int_to_ptr.vmem [resolvable:$true] %s106_s23 }
  0x12   : > { %p485_p13 = scmp.ne.s32.totalorder %s740_s1, %s484_s27  ;;  %p491_p3 = scmp.lt.u32.totalorder %s484_s27, %s740_s1 }
  0x13   : > { %p661_p12 = pnand %p742_p9, %p432_p11 }
  0x15   : > { %p486_p0 = pneg %p661_p12 }
  0x17   : > { %p487_p1 = pnand %p486_p0, %p485_p13 }
  0x19   : > { %p488_p2 = pneg %p487_p1 }
  0x1b   : > { %p493_p4 = pnand %p491_p3, %p488_p2 }
  0x1d   : > { %496 = shalt.err (!%p493_p4)
}
  0x1e   : > { %s497_s4 = scalar_lea.vmem %s107_s23, 2048  ;;  %p505_p9 = scmp.lt.s32.totalorder %s107_s23, %s107_s23 }
  0x1f   : > { %p498_p7 = scmp.ne.s32.totalorder %s107_s23, %s497_s4  ;;  %p506_p6 = scmp.lt.s32.totalorder %s497_s4, %s497_s4 }
  0x21   : > { %p500_p8 = pnand %p498_p7, %p486_p0  ;;  %p507_p5 = por %p506_p6, %p505_p9 }
  0x23   : > { %p501_p11 = pneg %p500_p8 }
  0x25   : > { %p508_p10 = pnand %p507_p5, %p501_p11 }
  0x27   : > { %511 = shalt.err (!%p508_p10)
}
  0x28   : > { %s581_s5 = smov 128   ;;  %s582_s6 = smov 8  }
  0x29   : > { %435 = dma.hbm_to_vmem [thread:$0]  (!%p661_p12), %s740_s1, 2048, %s107_s23, [#allocation3], %s581_s5, %s581_s5, %s582_s6  }
  0x2a   : > { %p749_p13 = scmp.ne.s32.totalorder %s747_s21, 0 }
  0x2b   : > { %p750_p1 = scmp.eq.s32.totalorder (!%p749_p13), %s625_s13, 0 }
  0x2c   : > { %129 = sbr.rel (%p749_p13) target bundleno = 416 (0x1a0), region = 28 }
  0x33   : > { %557 = dma.done.wait (%p750_p1), [#allocation3], 2048   ;;  %p751_p0 = pmov %p750_p1 }
  0x34   : > { %p150_p5 = scmp.lt.s32.totalorder %s625_s13, 1  ;;  %v583_v0 = vmov 0   ;;  %v584_v1 = vmov 0.0|0.0   ;;  %v163_v3 = vld [vmem:[#allocation2] sm:$0xff]  ;;  %v164_v4 = vld [vmem:[#allocation2 + $0x8] sm:$0xff]  ;;  %v165_v6 = vld [vmem:[#allocation2 + $0x10] sm:$0xff]  ;;  %v155_v28 = vlaneseq }
  0x35   : > { %559 = vsyncadd (%p751_p0), [#allocation3], 4294965248  ;;  %483 = vset.pattern.permute.xlu0 %v583_v0  ;;  %402 = vmatprep.subr.bf16.mxu0 %v584_v1  ;;  %v403_v5 = vpack.c.bf16 %v164_v4, %v163_v3  ;;  %v166_v7 = vld [vmem:[#allocation2 + $0x18] sm:$0xff]  ;;  %vm585_vm0 = vmmov 0   ;;  %v586_v8 = vmov 0.0   ;;  %v167_v10 = vld [vmem:[#allocation2 + $0x20] sm:$0xff] }
  0x36   : > { %s151_s14 = scalar_select %p150_p5, %s625_s13, 1  ;;  %399 = vmatprep.mubr.msk.f32.mxu0 %vm585_vm0, %v586_v8  ;;  %v406_v9 = vpack.c.bf16 %v166_v7, %v165_v6  ;;  %v168_v11 = vld [vmem:[#allocation2 + $0x28] sm:$0xff]  ;;  %v169_v13 = vld [vmem:[#allocation2 + $0x30] sm:$0xff]  ;;  %v170_v14 = vld [vmem:[#allocation2 + $0x38] sm:$0xff]  ;;  %v156_v29 = vand.u32 127, %v155_v28  ;;  %v587_v31 = vmov 1.0  }
  0x37   : > { %404 = vmatpush3.bf16.msra.mxu0 %v403_v5  ;;  %v409_v12 = vpack.c.bf16 %v168_v11, %v167_v10  ;;  %v412_v15 = vpack.c.bf16 %v170_v14, %v169_v13  ;;  %v171_v16 = vld [vmem:[#allocation2 + $0x40] sm:$0xff]  ;;  %v172_v17 = vld [vmem:[#allocation2 + $0x48] sm:$0xff]  ;;  %v173_v19 = vld [vmem:[#allocation2 + $0x50] sm:$0xff]  ;;  %s147_s23 = sand.u32 1, %s570_s10   ;;  %s347_s25 = sshll.u32 %s625_s13, 7 }
  0x38   : > { %s343_s16 = sshll.u32 %s151_s14, 3  ;;  %405 = vmatprep.subr.bf16.mxu0 %v584_v1  ;;  %v415_v18 = vpack.c.bf16 %v172_v17, %v171_v16  ;;  %v174_v20 = vld [vmem:[#allocation2 + $0x58] sm:$0xff]  ;;  %v175_v22 = vld [vmem:[#allocation2 + $0x60] sm:$0xff]  ;;  %v176_v23 = vld [vmem:[#allocation2 + $0x68] sm:$0xff]  ;;  %s342_s24 = sshll.u32 %s147_s23, 3 }
  0x39   : > { %s153_s21 = scalar_lea.vmem %s739_s0, %s343_s16  ;;  %v418_v21 = vpack.c.bf16 %v174_v20, %v173_v19  ;;  %v421_v24 = vpack.c.bf16 %v176_v23, %v175_v22  ;;  %v177_v25 = vld [vmem:[#allocation2 + $0x70] sm:$0xff]  ;;  %v178_v26 = vld [vmem:[#allocation2 + $0x78] sm:$0xff]  ;;  %s149_s26 = scalar_lea.vmem [#allocation5], %s342_s24 }
  0x3a   : > { %v154_v2 = vld [vmem:[%s153_s21] sm:$0xff]  ;;  %v424_v27 = vpack.c.bf16 %v178_v26, %v177_v25  ;;  %s265_s27 = sshll.u32 %s149_s26, 4  ;;  %s697_s30 = scalar_lea.hbm %s741_s2, %s347_s25  ;;  %s699_s27 = int_to_ptr.vmem [resolvable:$true] %s265_s27 }
  0x3b   : > { %158 = vperm.xlu0 %483, %v154_v2   ;;  %407 = vmatpush3.bf16.msra.mxu0 %v406_v9  ;;  %s252_s3 = scalar_lea.sflag [#allocation4], %s147_s23  ;;  %s512_s4 = scalar_lea.vmem %s699_s27, 128 }
  0x3c   : > { %408 = vmatprep.subr.bf16.mxu0 %v584_v1  ;;  %p513_p6 = scmp.ne.s32.totalorder %s699_s27, %s512_s4  ;;  %p752_p9 = scmp.ne.s32.totalorder %s745_s19, 0 }
  0x3d   : > { %s588_s13 = smov [#allocation5]  }
  0x3e   : > { %p514_p10 = pnand %p513_p6, %p752_p9  ;;  %s516_s5 = sshll.u32 %s588_s13, 4  ;;  %s517_s5 = int_to_ptr.vmem [resolvable:$false] %s516_s5 }
  0x3f   : > { %410 = vmatpush3.bf16.msra.mxu0 %v409_v12  ;;  %s518_s6 = scalar_lea.vmem %s517_s5, 256  ;;  %p519_p2 = scmp.lt.s32.totalorder %s699_s27, %s517_s5 }
  0x40   : > { %411 = vmatprep.subr.bf16.mxu0 %v584_v1  ;;  %p515_p12 = pneg %p514_p10  ;;  %p520_p3 = scmp.lt.s32.totalorder %s518_s6, %s512_s4 }
  0x42   : > { %p521_p4 = por %p520_p3, %p519_p2 }
  0x43   : > { %413 = vmatpush3.bf16.msra.mxu0 %v412_v15 }
  0x44   : > { %414 = vmatprep.subr.bf16.mxu0 %v584_v1  ;;  %p522_p7 = pnand %p521_p4, %p515_p12 }
  0x47   : > { %416 = vmatpush3.bf16.msra.mxu0 %v415_v18 }
  0x48   : > { %417 = vmatprep.subr.bf16.mxu0 %v584_v1 }
  0x4b   : > { %419 = vmatpush3.bf16.msra.mxu0 %v418_v21 }
  0x4c   : > { %420 = vmatprep.subr.bf16.mxu0 %v584_v1 }
  0x4f   : > { %422 = vmatpush3.bf16.msra.mxu0 %v421_v24 }
  0x50   : > { %423 = vmatprep.subr.bf16.mxu0 %v584_v1 }
  0x53   : > { %425 = vmatpush3.bf16.msra.mxu0 %v424_v27 }
  0xba   : > { %v159_v30 = vpop.permute.xlu0 %158 }
  0xbb   : > { %vm160_vm1 = vcmp.eq.s32.totalorder %v159_v30, %v156_v29 }
  0xbc   : > { %400 = vmatmul.mubr.msk.f32.vlgmr.msra.gmra.mrb[0].mxu0 %vm160_vm1, %v587_v31 }
 0x18f   : > { %v245_v32 = vpop.f32.mrb[0].mxu0 }
 0x190   : > { %v249_v33 = vmul.f32 5.656854, %v245_v32  ;;  %v401_v34 = vpop.f32.mrb[1].mxu0 }
 0x192   : > { %250 = vst [vmem:[%s149_s26] sm:$0xff] %v249_v33 }
 0x193   : > { %525 = shalt.err (!%p522_p7)
}
 0x194   : > { %s526_s7 = scalar_lea.hbm %s697_s30, 128  ;;  %s530_s16 = scalar_lea.hbm %s741_s2, 256 }
 0x195   : > { %p527_p8 = scmp.ne.s32.totalorder %s697_s30, %s526_s7  ;;  %p531_p1 = scmp.lt.u32.totalorder %s697_s30, %s741_s2 }
 0x196   : > { %p532_p0 = scmp.lt.u32.totalorder %s530_s16, %s526_s7  ;;  %p534_p6 = scmp.lt.u32.totalorder %s526_s7, %s697_s30 }
 0x197   : > { %p528_p11 = pnand %p527_p8, %p752_p9 }
 0x198   : > { %p533_p5 = por %p532_p0, %p531_p1 }
 0x199   : > { %p529_p13 = pneg %p528_p11 }
 0x19a   : > { %p535_p10 = por %p534_p6, %p533_p5 }
 0x19c   : > { %p536_p12 = pnand %p535_p10, %p529_p13 }
 0x19e   : > { %539 = shalt.err (!%p536_p12)
}
 0x19f   : > { %430 = dma.vmem_to_hbm [thread:$0]  (%p752_p9), %s699_s27, 128, %s697_s30, %s252_s3  }
 0x1a0 PF: > { %p442_p2 = scmp.ge.s32.totalorder %s578_s12, 2  ;;  %s277_s21 = sand.u32 1, %s566_s9  }
 0x1a1   : > { %p753_p3 = scmp.ne.s32.totalorder %s746_s20, 0  ;;  %s278_s23 = scalar_lea.sflag [#allocation4], %s277_s21 }
 0x1a3   : > { %p437_p4 = pnand %p442_p2, %p753_p3 }
 0x1a5   : > { %561 = dma.done.wait (!%p437_p4), %s278_s23, 128  }
 0x1a6   : > { %563 = vsyncadd (!%p437_p4), %s278_s23, 4294967168  ;;  %p13_p7 = scmp.ge.s32.totalorder %s629_s15, 4   ;;  %s754_s9 = smov %s570_s10 }
 0x1a7   : > { %s755_s10 = smov %s574_s11  ;;  %s756_s11 = smov %s640_s18 }
 0x1a8   : > { %s757_s12 = smov %s629_s15  ;;  %15 = sbr.rel (!%p13_p7) target bundleno = 4 (0x4), region = 68 }
 0x1af   :  { %283 = vsyncpa [#allocation3], 1 }
 0x1b0   :  { %285 = vsyncpa [#allocation3 + $0x1], 1 }
 0x1b1   :  { %286 = vsyncpa [#allocation4], 1 }
 0x1b2   :  { %288 = vsyncpa [#allocation4 + $0x1], 1 }

</bundles_post_ra>
